<compile_context>
chip_gen: v7x
topology: tpu7x:2x2x1
jax: 0.10.0
libtpu: 0.0.40
codegen_flags: <defaults>
</compile_context>

<pallas_src>
import functools

import jax
import jax.numpy as jnp
from jax.experimental import pallas as pl
from jax.experimental.pallas import tpu as pltpu

LANE = 128
SUBLANE = 8
TILE = SUBLANE * LANE                 # 1024 elements = one (8,128) f32 tile
MAX_BLOCK_ROWS = 8192                 # (8192,128) f32 = 4 MiB per input block


def _make_kernel(*, rows, block_rows, blocks, inner_steps, total_steps):
    """Builds the partial-sum kernel for a fixed static configuration."""
    # First grid step (in flattened block order) that needs masking:
    #  - the partial edge block (if rows % block_rows != 0), and
    #  - any overflow step from the 2-way megacore split (block_idx >= blocks),
    # both of which are handled by the same row-index mask.
    mask_start = blocks - 1 if (rows % block_rows) != 0 else blocks
    any_masked = mask_start < total_steps

    def kernel(yhat_ref, y_ref, out_ref):
        c = pl.program_id(0)
        i = pl.program_id(1)
        block_idx = c * inner_steps + i

        @pl.when(i == 0)
        def _():
            out_ref[...] = jnp.zeros_like(out_ref)

        def accumulate(masked):
            d = yhat_ref[...].astype(jnp.float32) - y_ref[...].astype(jnp.float32)
            if masked:
                row_ids = block_idx * block_rows + jax.lax.broadcasted_iota(
                    jnp.int32, (block_rows, LANE), 0)
                d = jnp.where(row_ids < rows, d, 0.0)
            sq = d * d
            # (block_rows, 128) -> (8, 128): adding vregs together, pure VPU.
            out_ref[...] += jnp.sum(
                sq.reshape(block_rows // SUBLANE, SUBLANE, LANE), axis=0)

        if any_masked:
            pl.when(block_idx < mask_start)(lambda: accumulate(False))
            pl.when(block_idx >= mask_start)(lambda: accumulate(True))
        else:
            accumulate(False)

    return kernel


def rmse_loss(yhat, y, *, max_block_rows=MAX_BLOCK_ROWS):
    assert yhat.shape == y.shape, "RMSELoss expects matching shapes"
    assert max_block_rows % SUBLANE == 0
    total_n = int(yhat.size)
    assert total_n > 0, "RMSELoss on empty input is undefined"

    yhat_f = jnp.ravel(yhat)
    y_f = jnp.ravel(y)

    # Kernel consumes the (8,128)-tile aligned prefix; the sub-tile tail
    # (< 1024 elements) is a negligible XLA epilogue (no jnp.pad copies).
    aligned_n = (total_n // TILE) * TILE
    if aligned_n < total_n:
        dt = (yhat_f[aligned_n:].astype(jnp.float32)
              - y_f[aligned_n:].astype(jnp.float32))
        tail_sum = jnp.sum(dt * dt)
    else:
        tail_sum = jnp.float32(0.0)

    if aligned_n == 0:
        # Entire input is smaller than one tile; pure XLA epilogue.
        return jnp.sqrt(tail_sum / jnp.float32(total_n))

    rows = aligned_n // LANE          # multiple of SUBLANE by construction
    yhat2d = yhat_f[:aligned_n].reshape(rows, LANE)
    y2d = y_f[:aligned_n].reshape(rows, LANE)

    block_rows = min(max_block_rows, rows)
    blocks = (rows + block_rows - 1) // block_rows

    # Always 2-way split the block stream when possible so a megacore chip
    # (v7x) keeps both TensorCores busy; the overflow step (odd block count)
    # re-reads a clamped block and is zeroed inside the kernel.
    if blocks >= 2:
        num_parallel = 2
        inner_steps = (blocks + 1) // 2
    else:
        num_parallel, inner_steps = 1, blocks
    total_steps = num_parallel * inner_steps

    def in_index_map(c, i):
        return (jnp.minimum(c * inner_steps + i, blocks - 1), 0)

    kernel = _make_kernel(rows=rows, block_rows=block_rows, blocks=blocks,
                          inner_steps=inner_steps, total_steps=total_steps)

    in_bytes = 2 * aligned_n * yhat2d.dtype.itemsize
    out_bytes = num_parallel * SUBLANE * LANE * 4

    partials = pl.pallas_call(
        kernel,
        out_shape=jax.ShapeDtypeStruct((num_parallel, SUBLANE, LANE),
                                       jnp.float32),
        grid_spec=pltpu.PrefetchScalarGridSpec(
            num_scalar_prefetch=0,
            grid=(num_parallel, inner_steps),
            in_specs=[
                pl.BlockSpec((block_rows, LANE), in_index_map),
                pl.BlockSpec((block_rows, LANE), in_index_map),
            ],
            # Squeezed leading dim: kernel accumulates directly into an
            # (8,128) resident f32 view.
            out_specs=pl.BlockSpec((None, SUBLANE, LANE),
                                   lambda c, i: (c, 0, 0)),
        ),
        compiler_params=pltpu.CompilerParams(
            dimension_semantics=("parallel", "arbitrary"),
            vmem_limit_bytes=32 * 1024 * 1024,
        ),
        cost_estimate=pl.CostEstimate(
            flops=3 * aligned_n,
            transcendentals=0,
            bytes_accessed=in_bytes + out_bytes,
        ),
    )(yhat2d, y2d)

    # Tiny epilogue: sum per-core (8,128) partials + tail, mean over the
    # original element count, sqrt. Scalar result (matches torch 0-dim loss).
    return jnp.sqrt((jnp.sum(partials) + tail_sum) / jnp.float32(total_n))


if __name__ == "__main__":
    key = jax.random.PRNGKey(0)
    k1, k2, k3, k4 = jax.random.split(key, 4)

    # Small NCHW-like regression output, consistent with a generic use of
    # RMSELoss. 2048 elements -> tile-aligned fast path, single full block.
    yhat = jax.random.normal(k1, (2, 4, 16, 16), dtype=jnp.float32)
    y = jax.random.normal(k2, (2, 4, 16, 16), dtype=jnp.float32)

    loss = rmse_loss(yhat, y)
    jax.block_until_ready(loss)
    ref = jnp.sqrt(jnp.mean((yhat - y) ** 2))
    assert jnp.allclose(loss, ref, rtol=1e-5, atol=1e-6), (loss, ref)

    # Secondary check: force a tiny block size so the partial-edge-block mask,
    # the odd-block-count megacore overflow step, and the sub-tile tail
    # epilogue are all exercised (locks in the masked-path correctness).
    yh2 = jax.random.normal(k3, (5170,), dtype=jnp.float32)
    y2 = jax.random.normal(k4, (5170,), dtype=jnp.float32)
    loss2 = rmse_loss(yh2, y2, max_block_rows=16)
    jax.block_until_ready(loss2)
    ref2 = jnp.sqrt(jnp.mean((yh2 - y2) ** 2))
    assert jnp.allclose(loss2, ref2, rtol=1e-5, atol=1e-6), (loss2, ref2)

    print("KERNEL_OK")
</pallas_src>

<mosaic_0001>
module attributes {stable_mosaic.version = 11 : i64} {
  func.func @kernel(%arg0: i32, %arg1: i32, %arg2: memref<16x128xf32, #tpu.memory_space<vmem>>, %arg3: memref<16x128xf32, #tpu.memory_space<vmem>>, %arg4: memref<1x8x128xf32, #tpu.memory_space<vmem>>) attributes {dimension_semantics = [#tpu.dimension_semantics<parallel>, #tpu.dimension_semantics<arbitrary>], iteration_bounds = array<i64: 1, 1>, scalar_prefetch = 0 : i64, scratch_operands = 0 : i64, tpu.core_type = #tpu.core_type<tc>, window_params = [{transform_indices = @transform_0, window_bounds = array<i64: 16, 128>}, {transform_indices = @transform_1, window_bounds = array<i64: 16, 128>}, {transform_indices = @transform_2, window_bounds = array<i64: 1, 8, 128>}]} {
    %c0_i32 = arith.constant 0 : i32
    %0 = arith.cmpi eq, %arg1, %c0_i32 : i32
    %1 = arith.extui %0 : i1 to i32
    %c0_i32_0 = arith.constant 0 : i32
    %2 = arith.cmpi ne, %1, %c0_i32_0 : i32
    scf.if %2 {
      %cst_10 = arith.constant 0.000000e+00 : f32
      %15 = vector.broadcast %cst_10 : f32 to vector<8x128xf32>
      %c0_11 = arith.constant 0 : index
      %c0_12 = arith.constant 0 : index
      %c0_13 = arith.constant 0 : index
      %16 = vector.load %arg4[%c0_11, %c0_12, %c0_13] : memref<1x8x128xf32, #tpu.memory_space<vmem>>, vector<1x8x128xf32>
      %17 = vector.shape_cast %16 : vector<1x8x128xf32> to vector<8x128xf32>
      %18 = vector.shape_cast %15 : vector<8x128xf32> to vector<1x8x128xf32>
      tpu.vector_store %arg4[%c0_11, %c0_12, %c0_13], %18 {strides = array<i32>} : memref<1x8x128xf32, #tpu.memory_space<vmem>>, vector<1x8x128xf32>,
    } else {
    }
    %c0 = arith.constant 0 : index
    %c0_1 = arith.constant 0 : index
    %3 = vector.load %arg2[%c0, %c0_1] : memref<16x128xf32, #tpu.memory_space<vmem>>, vector<16x128xf32>
    %c0_2 = arith.constant 0 : index
    %c0_3 = arith.constant 0 : index
    %4 = vector.load %arg3[%c0_2, %c0_3] : memref<16x128xf32, #tpu.memory_space<vmem>>, vector<16x128xf32>
    %5 = arith.subf %3, %4 : vector<16x128xf32>
    %6 = arith.mulf %5, %5 : vector<16x128xf32>
    %c0_4 = arith.constant 0 : index
    %c0_5 = arith.constant 0 : index
    %c0_6 = arith.constant 0 : index
    %7 = vector.load %arg4[%c0_4, %c0_5, %c0_6] : memref<1x8x128xf32, #tpu.memory_space<vmem>>, vector<1x8x128xf32>
    %8 = vector.shape_cast %7 : vector<1x8x128xf32> to vector<8x128xf32>
    %9 = vector.shape_cast %6 : vector<16x128xf32> to vector<2x8x128xf32>
    %cst = arith.constant dense<0.000000e+00> : vector<8x128xf32>
    %10 = vector.multi_reduction <add>, %9, %cst [0] : vector<2x8x128xf32> to vector<8x128xf32>
    %11 = arith.addf %8, %10 : vector<8x128xf32>
    %c0_7 = arith.constant 0 : index
    %c0_8 = arith.constant 0 : index
    %c0_9 = arith.constant 0 : index
    %12 = vector.load %arg4[%c0_7, %c0_8, %c0_9] : memref<1x8x128xf32, #tpu.memory_space<vmem>>, vector<1x8x128xf32>
    %13 = vector.shape_cast %12 : vector<1x8x128xf32> to vector<8x128xf32>
    %14 = vector.shape_cast %11 : vector<8x128xf32> to vector<1x8x128xf32>
    tpu.vector_store %arg4[%c0_7, %c0_8, %c0_9], %14 {strides = array<i32>} : memref<1x8x128xf32, #tpu.memory_space<vmem>>, vector<1x8x128xf32>,
    return
  }
  func.func @transform_0(%arg0: i32, %arg1: i32) -> (i32, i32) {
    %c1_i32 = arith.constant 1 : i32
    %0 = arith.muli %arg0, %c1_i32 : i32
    %1 = arith.addi %0, %arg1 : i32
    %c0_i32 = arith.constant 0 : i32
    %2 = arith.minsi %1, %c0_i32 : i32
    %c0_i32_0 = arith.constant 0 : i32
    %c0_i32_1 = arith.constant 0 : i32
    return %2, %c0_i32_0 : i32, i32
  }
  func.func @transform_1(%arg0: i32, %arg1: i32) -> (i32, i32) {
    %c1_i32 = arith.constant 1 : i32
    %0 = arith.muli %arg0, %c1_i32 : i32
    %1 = arith.addi %0, %arg1 : i32
    %c0_i32 = arith.constant 0 : i32
    %2 = arith.minsi %1, %c0_i32 : i32
    %c0_i32_0 = arith.constant 0 : i32
    %c0_i32_1 = arith.constant 0 : i32
    return %2, %c0_i32_0 : i32, i32
  }
  func.func @transform_2(%arg0: i32, %arg1: i32) -> (i32, i32, i32) {
    %c0_i32 = arith.constant 0 : i32
    %c0_i32_0 = arith.constant 0 : i32
    %c0_i32_1 = arith.constant 0 : i32
    return %arg0, %c0_i32, %c0_i32_0 : i32, i32, i32
  }
}

</mosaic_0001>

<bundles_post_ra>
// kernel: tpu_custom_call.1
= control target key start
LH: loop header
LB: loop body
LE: loop exit
PB: predicated region body
PF: predicated region fallthrough
CT: control target
= control target key end

     0   :  { %7 = vsyncpa [#allocation3], 0  ;;  %s231_s0 = inlined_call_operand.hbm [shape: f32[16,128], index: 0, kind: input, shape index: {}]   ;;  %s232_s1 = inlined_call_operand.hbm [shape: f32[16,128], index: 1, kind: input, shape index: {}]   ;;  %s233_s2 = inlined_call_operand.hbm [shape: f32[1,8,128], index: 2, kind: output, shape index: {}]  }
   0x1   :  { %8 = vsyncpa [#allocation6], 0 }
   0x2   :  { %9 = vsyncpa [#allocation4], 0  ;;  %s175_s9 = smov [#allocation2]   ;;  %s103_s13 = scalar_lea.hbm %s231_s0, 256 }
   0x3   :  { %s21_s10 = sshll.u32 %s175_s9, 4  ;;  %p104_p0 = scmp.ne.s32.totalorder %s231_s0, %s103_s13  ;;  %s22_s10 = int_to_ptr.vmem [resolvable:$true] %s21_s10 }
   0x4   :  { %p107_p1 = scmp.lt.u32.totalorder %s103_s13, %s231_s0 }
   0x6   :  { %p109_p2 = pnand %p107_p1, %p104_p0 }
   0x8   :  { %112 = shalt.err (!%p109_p2)
}
   0x9   :  { %s113_s18 = scalar_lea.vmem %s22_s10, 256  ;;  %p118_p4 = scmp.lt.s32.totalorder %s22_s10, %s22_s10 }
   0xa   :  { %p114_p3 = scmp.ne.s32.totalorder %s22_s10, %s113_s18  ;;  %p119_p5 = scmp.lt.s32.totalorder %s113_s18, %s113_s18 }
   0xc   :  { %p120_p6 = por %p119_p5, %p118_p4 }
   0xe   :  { %p121_p7 = pnand %p120_p6, %p114_p3 }
  0x10   :  { %124 = shalt.err (!%p121_p7)
}
  0x11   :  { %s176_s19 = smov 128   ;;  %s177_s20 = smov 8  }
  0x12   :  { %27 = dma.hbm_to_vmem [thread:$0]  %s231_s0, 256, %s22_s10, [#allocation3], %s176_s19, %s176_s19, %s177_s20  }
  0x13   :  { %s178_s23 = smov [#allocation5]   ;;  %s125_s27 = scalar_lea.hbm %s232_s1, 256 }
  0x14   :  { %s39_s24 = sshll.u32 %s178_s23, 4  ;;  %p126_p8 = scmp.ne.s32.totalorder %s232_s1, %s125_s27  ;;  %s40_s24 = int_to_ptr.vmem [resolvable:$true] %s39_s24 }
  0x15   :  { %p129_p9 = scmp.lt.u32.totalorder %s125_s27, %s232_s1 }
  0x17   :  { %p131_p10 = pnand %p129_p9, %p126_p8 }
  0x19   :  { %134 = shalt.err (!%p131_p10)
}
  0x1a   :  { %s135_s4 = scalar_lea.vmem %s40_s24, 256  ;;  %p140_p12 = scmp.lt.s32.totalorder %s40_s24, %s40_s24 }
  0x1b   :  { %p136_p11 = scmp.ne.s32.totalorder %s40_s24, %s135_s4  ;;  %p141_p13 = scmp.lt.s32.totalorder %s135_s4, %s135_s4 }
  0x1d   :  { %p142_p0 = por %p141_p13, %p140_p12 }
  0x1f   :  { %p143_p1 = pnand %p142_p0, %p136_p11 }
  0x21   :  { %146 = shalt.err (!%p143_p1)
}
  0x22   :  { %45 = dma.hbm_to_vmem [thread:$0]  %s232_s1, 256, %s40_s24, [#allocation6], %s176_s19, %s176_s19, %s177_s20  }
  0x23   :  { %169 = dma.done.wait [#allocation3], 256  }
  0x24   :  { %170 = vsyncadd [#allocation3], 4294967040 }
  0x25   :  { %171 = dma.done.wait [#allocation6], 256  }
  0x26   :  { %172 = vsyncadd [#allocation6], 4294967040  ;;  %v65_v0 = vld [vmem:[#allocation2] sm:$0xff]  ;;  %v66_v1 = vld [vmem:[#allocation2 + $0x8] sm:$0xff]  ;;  %s179_s6 = smov [#allocation7]  }
  0x27   :  { %v67_v2 = vld [vmem:[#allocation5] sm:$0xff]  ;;  %v68_v3 = vld [vmem:[#allocation5 + $0x8] sm:$0xff]  ;;  %s83_s7 = sshll.u32 %s179_s6, 4  ;;  %s84_s7 = int_to_ptr.vmem [resolvable:$true] %s83_s7 }
  0x28   :  { %v69_v4 = vsub.f32 %v65_v0, %v67_v2  ;;  %v70_v5 = vsub.f32 %v66_v1, %v68_v3  ;;  %s147_s8 = scalar_lea.vmem %s84_s7, 128  ;;  %p152_p3 = scmp.lt.s32.totalorder %s84_s7, %s84_s7 }
  0x29   :  { %p148_p2 = scmp.ne.s32.totalorder %s84_s7, %s147_s8  ;;  %p153_p4 = scmp.lt.s32.totalorder %s147_s8, %s147_s8 }
  0x2a   :  { %v71_v6 = vmul.f32 %v69_v4, %v69_v4  ;;  %v72_v7 = vmul.f32 %v70_v5, %v70_v5 }
  0x2b   :  { %p154_p5 = por %p153_p4, %p152_p3 }
  0x2c   :  { %v74_v8 = vadd.f32 %v72_v7, %v71_v6 }
  0x2d   :  { %p155_p6 = pnand %p154_p5, %p148_p2 }
  0x2e   :  { %76 = vst [vmem:[#allocation7] sm:$0xff] %v74_v8 }
  0x2f   :  { %158 = shalt.err (!%p155_p6)
}
  0x30   :  { %s159_s10 = scalar_lea.hbm %s233_s2, 128 }
  0x31   :  { %p160_p7 = scmp.ne.s32.totalorder %s233_s2, %s159_s10  ;;  %p163_p8 = scmp.lt.u32.totalorder %s159_s10, %s233_s2 }
  0x33   :  { %p165_p9 = pnand %p163_p8, %p160_p7 }
  0x35   :  { %168 = shalt.err (!%p165_p9)
}
  0x36   :  { %86 = dma.vmem_to_hbm [thread:$0]  %s84_s7, 128, %s233_s2, [#allocation4]  }
  0x37   :  { %173 = dma.done.wait [#allocation4], 128  }
  0x38   :  { %174 = vsyncadd [#allocation4], 4294967168 }
  0x39   :  { %90 = vsyncpa [#allocation3], 1 }
  0x3a   :  { %91 = vsyncpa [#allocation6], 1 }
  0x3b   :  { %92 = vsyncpa [#allocation4], 1 }

</bundles_post_ra>
